<compile_context>
chip_gen: v7x
topology: tpu7x:2x2x1
jax: 0.10.0
libtpu: 0.0.40
codegen_flags: <defaults>
</compile_context>

<pallas_src>
import functools
import math

import jax
import jax.numpy as jnp
from jax import lax
from jax.experimental import pallas as pl
from jax.experimental.pallas import tpu as pltpu


def _conv_kernel(x_ref, w_ref, b_ref, o_ref, slab_ref, *,
                 ksize, dilation, pad, length, bblk, c_in):
    """One grid step: Bblk batch elements -> one lane-dense (C_out, Bblk*L) slab.

    x_ref:    (Bblk, C_in, L)      unpadded input tile
    w_ref:    (C_out, K*C_in)      taps folded (k-major) into the contraction
    b_ref:    (C_out, 1)
    o_ref:    (1, C_out, Bblk*L)   lane-dense output slab
    slab_ref: (K*C_in, Bblk*L)     VMEM im2col scratch
    """
    for b in range(bblk):                         # static unroll (bblk modest)
        xb = x_ref[b]                             # (C_in, L)
        if pad > 0:
            # Circular wrap built ONCE per batch element.
            xpad = jnp.concatenate(
                [xb[:, length - pad:], xb, xb[:, :pad]], axis=1)
        else:
            xpad = xb
        # K dilated taps are static slices of the wrapped block, written
        # straight into the im2col scratch (no concat tree, no rolls).
        for k in range(ksize):
            start = k * dilation
            slab_ref[k * c_in:(k + 1) * c_in,
                     b * length:(b + 1) * length] = xpad[:, start:start + length]

    # Single fused MXU matmul: contraction = K*C_in, columns = Bblk*L.
    out = jnp.dot(w_ref[...], slab_ref[...], preferred_element_type=jnp.float32)
    out = out + b_ref[...].astype(jnp.float32)    # bias add stays in f32
    o_ref[0] = out.astype(o_ref.dtype)


def _pick_batch_block(n, c_in, c_out, ksize, length, itemsize):
    """Pick Bblk: ~2048 lane columns, 128-aligned if possible, VMEM-safe,
    and (when it doesn't destroy lane density) at least 2 grid steps."""
    if n <= 1:
        return 1
    target_cols = 2048
    bblk = min(n, max(1, target_cols // max(length, 1)))

    # Prefer bblk*L to be a multiple of 128 when the batch allows it.
    step = 128 // math.gcd(length, 128)
    if step > 1:
        if bblk >= step:
            bblk = (bblk // step) * step
        elif n >= step:
            bblk = step

    # VMEM working-set cap: double-buffered input/output blocks + im2col
    # scratch.  Budget leaves headroom even on v7x's 64 MiB VMEM.
    def ws_bytes(b):
        cols = b * length
        return (2 * b * c_in * length          # input block (double buffered)
                + 2 * c_out * cols             # output block (double buffered)
                + ksize * c_in * cols          # im2col scratch
                ) * itemsize
    budget = 20 * 1024 * 1024
    while bblk > 1 and ws_bytes(bblk) > budget:
        bblk = max(1, bblk // 2)

    # Keep >=2 grid steps so v7x's second TensorCore can be used, unless that
    # would drop the output slab below one full 128-lane tile while a
    # lane-dense option exists.
    half = max(1, -(-n // 2))
    if half < bblk:
        if half * length >= 128 or bblk * length < 128:
            bblk = half
    return max(1, bblk)


def dilated_circ_conv(x, weight, bias, *, n_adj=4, dilation=1):
    """x: (N, C_in, L); weight: (C_out, C_in, 2*n_adj+1); bias: (C_out,)."""
    n, c_in, length = x.shape
    c_out, c_in_w, ksize = weight.shape
    assert c_in_w == c_in and ksize == 2 * n_adj + 1
    pad = n_adj * dilation
    # TODO(synk): pad > length would need multi-wrap circular indexing; the
    # PyTorch module implicitly assumes pad <= length as well.
    assert pad <= length, "circular pad wider than the sequence is unsupported"

    # Fold taps into the contraction dim: w2[o, k*C_in + i] = weight[o, i, k].
    w2 = jnp.transpose(weight, (0, 2, 1)).reshape(c_out, ksize * c_in)
    bias2d = bias.reshape(c_out, 1)

    itemsize = jnp.dtype(x.dtype).itemsize
    bblk = _pick_batch_block(n, c_in, c_out, ksize, length, itemsize)
    grid_n = -(-n // bblk)
    n_pad = grid_n * bblk
    if n_pad != n:
        x = jnp.concatenate(
            [x, jnp.zeros((n_pad - n, c_in, length), x.dtype)], axis=0)

    cols = bblk * length
    kernel = functools.partial(
        _conv_kernel, ksize=ksize, dilation=dilation, pad=pad,
        length=length, bblk=bblk, c_in=c_in)

    cost = pl.CostEstimate(
        flops=2 * n_pad * c_out * c_in * ksize * length,
        transcendentals=0,
        bytes_accessed=(x.size + w2.size + bias2d.size
                        + n_pad * c_out * length) * itemsize)

    out = pl.pallas_call(
        kernel,
        out_shape=jax.ShapeDtypeStruct((grid_n, c_out, cols), x.dtype),
        grid_spec=pltpu.PrefetchScalarGridSpec(
            num_scalar_prefetch=0,
            grid=(grid_n,),
            in_specs=[
                pl.BlockSpec((bblk, c_in, length), lambda g: (g, 0, 0)),
                # constant index maps -> weight/bias stay resident in VMEM
                pl.BlockSpec((c_out, ksize * c_in), lambda g: (0, 0)),
                pl.BlockSpec((c_out, 1), lambda g: (0, 0)),
            ],
            out_specs=pl.BlockSpec((1, c_out, cols), lambda g: (g, 0, 0)),
            scratch_shapes=[pltpu.VMEM((ksize * c_in, cols), x.dtype)],
        ),
        compiler_params=pltpu.CompilerParams(
            dimension_semantics=("parallel",),
            vmem_limit_bytes=48 * 1024 * 1024),
        cost_estimate=cost,
    )(x, w2, bias2d)

    # Layout plumbing back to (N, C_out, L): slab columns are (b_local, j).
    out = out.reshape(grid_n, c_out, bblk, length)
    out = jnp.transpose(out, (0, 2, 1, 3)).reshape(n_pad, c_out, length)
    return out[:n]


def _reference(x, weight, bias, *, n_adj, dilation):
    pad = n_adj * dilation
    if n_adj != 0:
        x = jnp.concatenate([x[..., -pad:], x, x[..., :pad]], axis=2)
    out = lax.conv_general_dilated(
        x, weight,
        window_strides=(1,),
        padding="VALID",
        rhs_dilation=(dilation,),
        dimension_numbers=("NCH", "OIH", "NCH"),
    )
    return out + bias.reshape(1, -1, 1)


if __name__ == "__main__":
    # small shapes consistent with the module
    N, C_IN, C_OUT, L = 2, 4, 4, 16
    N_ADJ, DILATION = 4, 1
    K = 2 * N_ADJ + 1

    key = jax.random.PRNGKey(0)
    kx, kw, kb = jax.random.split(key, 3)
    x = jax.random.normal(kx, (N, C_IN, L), dtype=jnp.float32)
    # deterministic synthetic Conv1d parameters (shapes per nn.Conv1d)
    weight = jax.random.normal(kw, (C_OUT, C_IN, K), dtype=jnp.float32) * 0.1
    bias = jax.random.normal(kb, (C_OUT,), dtype=jnp.float32) * 0.1

    out = dilated_circ_conv(x, weight, bias, n_adj=N_ADJ, dilation=DILATION)
    out = jax.block_until_ready(out)

    ref = _reference(x, weight, bias, n_adj=N_ADJ, dilation=DILATION)
    assert out.shape == (N, C_OUT, L)
    assert jnp.allclose(out, ref, atol=1e-5, rtol=1e-5)
    print("KERNEL_OK")
</pallas_src>

<mosaic_0001>
module attributes {stable_mosaic.version = 11 : i64} {
  func.func @_conv_kernel(%arg0: i32, %arg1: memref<1x4x16xf32, #tpu.memory_space<vmem>>, %arg2: memref<4x36xf32, #tpu.memory_space<vmem>>, %arg3: memref<4x1xf32, #tpu.memory_space<vmem>>, %arg4: memref<1x4x16xf32, #tpu.memory_space<vmem>>, %arg5: memref<36x16xf32, #tpu.memory_space<vmem>>) attributes {dimension_semantics = [#tpu.dimension_semantics<parallel>], iteration_bounds = array<i64: 2>, scalar_prefetch = 0 : i64, scratch_operands = 1 : i64, tpu.core_type = #tpu.core_type<tc>, window_params = [{transform_indices = @transform_0, window_bounds = array<i64: 1, 4, 16>}, {pipeline_mode = #tpu.pipeline_mode<synchronous>, transform_indices = @transform_1, window_bounds = array<i64: 4, 36>}, {pipeline_mode = #tpu.pipeline_mode<synchronous>, transform_indices = @transform_2, window_bounds = array<i64: 4, 1>}, {transform_indices = @transform_3, window_bounds = array<i64: 1, 4, 16>}]} {
    %c0 = arith.constant 0 : index
    %c0_0 = arith.constant 0 : index
    %c0_1 = arith.constant 0 : index
    %0 = vector.load %arg1[%c0, %c0_0, %c0_1] : memref<1x4x16xf32, #tpu.memory_space<vmem>>, vector<1x4x16xf32>
    %1 = vector.shape_cast %0 : vector<1x4x16xf32> to vector<4x16xf32>
    %2 = vector.extract_strided_slice %1 {offsets = [0, 12], sizes = [4, 4], strides = [1, 1]} : vector<4x16xf32> to vector<4x4xf32>
    %3 = vector.extract_strided_slice %1 {offsets = [0, 0], sizes = [4, 4], strides = [1, 1]} : vector<4x16xf32> to vector<4x4xf32>
    %4 = tpu.concatenate %2, %1, %3 in 1 : vector<4x4xf32>, vector<4x16xf32>, vector<4x4xf32> -> vector<4x24xf32>
    %5 = vector.extract_strided_slice %4 {offsets = [0, 0], sizes = [4, 16], strides = [1, 1]} : vector<4x24xf32> to vector<4x16xf32>
    %c0_2 = arith.constant 0 : index
    %c0_3 = arith.constant 0 : index
    %6 = vector.load %arg5[%c0_2, %c0_3] : memref<36x16xf32, #tpu.memory_space<vmem>>, vector<4x16xf32>
    tpu.vector_store %arg5[%c0_2, %c0_3], %5 {strides = array<i32>} : memref<36x16xf32, #tpu.memory_space<vmem>>, vector<4x16xf32>,
    %7 = vector.extract_strided_slice %4 {offsets = [0, 1], sizes = [4, 16], strides = [1, 1]} : vector<4x24xf32> to vector<4x16xf32>
    %c4 = arith.constant 4 : index
    %c0_4 = arith.constant 0 : index
    %8 = vector.load %arg5[%c4, %c0_4] : memref<36x16xf32, #tpu.memory_space<vmem>>, vector<4x16xf32>
    tpu.vector_store %arg5[%c4, %c0_4], %7 {strides = array<i32>} : memref<36x16xf32, #tpu.memory_space<vmem>>, vector<4x16xf32>,
    %9 = vector.extract_strided_slice %4 {offsets = [0, 2], sizes = [4, 16], strides = [1, 1]} : vector<4x24xf32> to vector<4x16xf32>
    %c8 = arith.constant 8 : index
    %c0_5 = arith.constant 0 : index
    %10 = vector.load %arg5[%c8, %c0_5] : memref<36x16xf32, #tpu.memory_space<vmem>>, vector<4x16xf32>
    tpu.vector_store %arg5[%c8, %c0_5], %9 {strides = array<i32>} : memref<36x16xf32, #tpu.memory_space<vmem>>, vector<4x16xf32>,
    %11 = vector.extract_strided_slice %4 {offsets = [0, 3], sizes = [4, 16], strides = [1, 1]} : vector<4x24xf32> to vector<4x16xf32>
    %c12 = arith.constant 12 : index
    %c0_6 = arith.constant 0 : index
    %12 = vector.load %arg5[%c12, %c0_6] : memref<36x16xf32, #tpu.memory_space<vmem>>, vector<4x16xf32>
    tpu.vector_store %arg5[%c12, %c0_6], %11 {strides = array<i32>} : memref<36x16xf32, #tpu.memory_space<vmem>>, vector<4x16xf32>,
    %13 = vector.extract_strided_slice %4 {offsets = [0, 4], sizes = [4, 16], strides = [1, 1]} : vector<4x24xf32> to vector<4x16xf32>
    %c16 = arith.constant 16 : index
    %c0_7 = arith.constant 0 : index
    %14 = vector.load %arg5[%c16, %c0_7] : memref<36x16xf32, #tpu.memory_space<vmem>>, vector<4x16xf32>
    tpu.vector_store %arg5[%c16, %c0_7], %13 {strides = array<i32>} : memref<36x16xf32, #tpu.memory_space<vmem>>, vector<4x16xf32>,
    %15 = vector.extract_strided_slice %4 {offsets = [0, 5], sizes = [4, 16], strides = [1, 1]} : vector<4x24xf32> to vector<4x16xf32>
    %c20 = arith.constant 20 : index
    %c0_8 = arith.constant 0 : index
    %16 = vector.load %arg5[%c20, %c0_8] : memref<36x16xf32, #tpu.memory_space<vmem>>, vector<4x16xf32>
    tpu.vector_store %arg5[%c20, %c0_8], %15 {strides = array<i32>} : memref<36x16xf32, #tpu.memory_space<vmem>>, vector<4x16xf32>,
    %17 = vector.extract_strided_slice %4 {offsets = [0, 6], sizes = [4, 16], strides = [1, 1]} : vector<4x24xf32> to vector<4x16xf32>
    %c24 = arith.constant 24 : index
    %c0_9 = arith.constant 0 : index
    %18 = vector.load %arg5[%c24, %c0_9] : memref<36x16xf32, #tpu.memory_space<vmem>>, vector<4x16xf32>
    tpu.vector_store %arg5[%c24, %c0_9], %17 {strides = array<i32>} : memref<36x16xf32, #tpu.memory_space<vmem>>, vector<4x16xf32>,
    %19 = vector.extract_strided_slice %4 {offsets = [0, 7], sizes = [4, 16], strides = [1, 1]} : vector<4x24xf32> to vector<4x16xf32>
    %c28 = arith.constant 28 : index
    %c0_10 = arith.constant 0 : index
    %20 = vector.load %arg5[%c28, %c0_10] : memref<36x16xf32, #tpu.memory_space<vmem>>, vector<4x16xf32>
    tpu.vector_store %arg5[%c28, %c0_10], %19 {strides = array<i32>} : memref<36x16xf32, #tpu.memory_space<vmem>>, vector<4x16xf32>,
    %21 = vector.extract_strided_slice %4 {offsets = [0, 8], sizes = [4, 16], strides = [1, 1]} : vector<4x24xf32> to vector<4x16xf32>
    %c32 = arith.constant 32 : index
    %c0_11 = arith.constant 0 : index
    %22 = vector.load %arg5[%c32, %c0_11] : memref<36x16xf32, #tpu.memory_space<vmem>>, vector<4x16xf32>
    tpu.vector_store %arg5[%c32, %c0_11], %21 {strides = array<i32>} : memref<36x16xf32, #tpu.memory_space<vmem>>, vector<4x16xf32>,
    %c0_12 = arith.constant 0 : index
    %c0_13 = arith.constant 0 : index
    %23 = vector.load %arg2[%c0_12, %c0_13] : memref<4x36xf32, #tpu.memory_space<vmem>>, vector<4x36xf32>
    %c0_14 = arith.constant 0 : index
    %c0_15 = arith.constant 0 : index
    %24 = vector.load %arg5[%c0_14, %c0_15] : memref<36x16xf32, #tpu.memory_space<vmem>>, vector<36x16xf32>
    %cst = arith.constant dense<0.000000e+00> : vector<4x16xf32>
    %25 = tpu.matmul %23, %24, %cst {dimension_numbers = #tpu.dot_dimension_numbers<[1], [0], [0], [1], [0, 0, 1, 1], [], []>} : vector<4x36xf32>, vector<36x16xf32>, vector<4x16xf32> -> vector<4x16xf32>
    %c0_16 = arith.constant 0 : index
    %c0_17 = arith.constant 0 : index
    %26 = vector.load %arg3[%c0_16, %c0_17] : memref<4x1xf32, #tpu.memory_space<vmem>>, vector<4x1xf32>
    %27 = vector.broadcast %26 : vector<4x1xf32> to vector<4x16xf32>
    %28 = arith.addf %25, %27 : vector<4x16xf32>
    %c0_18 = arith.constant 0 : index
    %c0_19 = arith.constant 0 : index
    %c0_20 = arith.constant 0 : index
    %29 = vector.load %arg4[%c0_18, %c0_19, %c0_20] : memref<1x4x16xf32, #tpu.memory_space<vmem>>, vector<1x4x16xf32>
    %30 = vector.shape_cast %29 : vector<1x4x16xf32> to vector<4x16xf32>
    %31 = vector.shape_cast %28 : vector<4x16xf32> to vector<1x4x16xf32>
    tpu.vector_store %arg4[%c0_18, %c0_19, %c0_20], %31 {strides = array<i32>} : memref<1x4x16xf32, #tpu.memory_space<vmem>>, vector<1x4x16xf32>,
    return
  }
  func.func @transform_0(%arg0: i32) -> (i32, i32, i32) {
    %c0_i32 = arith.constant 0 : i32
    %c0_i32_0 = arith.constant 0 : i32
    %c0_i32_1 = arith.constant 0 : i32
    return %arg0, %c0_i32, %c0_i32_0 : i32, i32, i32
  }
  func.func @transform_1(%arg0: i32) -> (i32, i32) {
    %c0_i32 = arith.constant 0 : i32
    %c0_i32_0 = arith.constant 0 : i32
    %c0_i32_1 = arith.constant 0 : i32
    return %c0_i32, %c0_i32_0 : i32, i32
  }
  func.func @transform_2(%arg0: i32) -> (i32, i32) {
    %c0_i32 = arith.constant 0 : i32
    %c0_i32_0 = arith.constant 0 : i32
    %c0_i32_1 = arith.constant 0 : i32
    return %c0_i32, %c0_i32_0 : i32, i32
  }
  func.func @transform_3(%arg0: i32) -> (i32, i32, i32) {
    %c0_i32 = arith.constant 0 : i32
    %c0_i32_0 = arith.constant 0 : i32
    %c0_i32_1 = arith.constant 0 : i32
    return %arg0, %c0_i32, %c0_i32_0 : i32, i32, i32
  }
}

</mosaic_0001>

<bundles_post_ra>
// kernel: tpu_custom_call.1
= control target key start
LH: loop header
LB: loop body
LE: loop exit
PB: predicated region body
PF: predicated region fallthrough
CT: control target
= control target key end

     0   :  { %8 = vsyncpa [#allocation4], 0  ;;  %s829_s0 = inlined_call_operand.hbm [shape: f32[2,4,16], index: 0, kind: input, shape index: {}]   ;;  %s830_s1 = inlined_call_operand.vmem [shape: f32[4,36], index: 1, kind: input, shape index: {}]   ;;  %s831_s2 = inlined_call_operand.vmem [shape: f32[4,1], index: 2, kind: input, shape index: {}]   ;;  %s832_s3 = inlined_call_operand.hbm [shape: f32[2,4,16], index: 3, kind: output, shape index: {}]  }
   0x1   :  { %10 = vsyncpa [#allocation4 + $0x1], 0 }
   0x2   :  { %11 = vsyncpa [#allocation5], 0 }
   0x3   :  { %13 = vsyncpa [#allocation5 + $0x1], 0  ;;  %s648_s12 = smov 0   ;;  %s650_s13 = smov 0  }
   0x4   :  { %s652_s14 = smov 0   ;;  %s654_s15 = smov 0  }
   0x5 LB: > { %s669_s16 = sadd.s32 4294967295, %s609_s15   ;;  %s411_s17 = sadd.s32 4294967294, %s609_s15   ;;  %s609_s15 = sphi %s654_s15, %s847_s15   ;;  %s605_s14 = sphi %s652_s14, %s846_s14   ;;  %s601_s13 = sphi %s650_s13, %s845_s13   ;;  %s597_s12 = sphi %s648_s12, %s844_s12  }
   0x6   : > { %s673_s18 = sadd.s32 1, %s609_s15   ;;  %s26_s19 = sadd.s32 1, %s605_s14 }
   0x7   : > { %s23_s20 = ssub.s32 %s609_s15, %s673_s18  ;;  %p33_p0 = scmp.ne.s32.totalorder %s605_s14, %s601_s13 }
   0x8   : > { %p24_p1 = scmp.eq.s32.totalorder %s23_s20, 0  ;;  %p34_p2 = scmp.eq.s32.totalorder %s609_s15, 0 }
   0x9   : > { %p39_p3 = scmp.ne.s32.totalorder %s601_s13, %s597_s12  ;;  %p40_p4 = scmp.eq.s32.totalorder %s669_s16, 0 }
   0xa   : > { %s685_s21 = scalar_select %p24_p1, %s605_s14, %s26_s19  }
   0xb   : > { %p687_p5 = por %p34_p2, %p33_p0  ;;  %p691_p6 = por %p40_p4, %p39_p3 }
   0xc   : > { %p105_p7 = scmp.eq.s32.totalorder %s669_s16, 1  ;;  %p111_p8 = scmp.eq.s32.totalorder %s411_s17, 1 }
   0xd   : > { %p462_p10 = scmp.lt.s32.totalorder %s609_s15, 2  ;;  %s137_s26 = sand.u32 1, %s605_s14  }
   0xe   : > { %p698_p11 = por %p105_p7, %p33_p0  ;;  %p702_p12 = por %p111_p8, %p39_p3 }
   0xf   : > { %s415_s27 = sshll.u32 %s609_s15, 6  ;;  %s414_s28 = sshll.u32 %s137_s26, 2 }
  0x10   : > { %s836_s24 = scalar_select %p698_p11, 1, 0 }
  0x11   : > { %s837_s25 = scalar_select %p702_p12, 1, 0 }
  0x12   : > { %s711_s4 = scalar_lea.hbm %s829_s0, %s415_s27  ;;  %s141_s5 = scalar_lea.vmem [#allocation3], %s414_s28 }
  0x13   : > { %s148_s6 = sshll.u32 %s141_s5, 4  ;;  %p715_p13 = pnand %p462_p10, %p687_p5  ;;  %s719_s6 = int_to_ptr.vmem [resolvable:$true] %s148_s6 }
  0x14   : > { %s138_s8 = scalar_lea.sflag [#allocation4], %s137_s26  ;;  %s513_s9 = scalar_lea.hbm %s711_s4, 64 }
  0x15   : > { %p514_p2 = scmp.ne.s32.totalorder %s711_s4, %s513_s9  ;;  %p515_p3 = pneg %p715_p13 }
  0x16   : > { %s518_s17 = scalar_lea.hbm %s829_s0, 128  ;;  %p519_p5 = scmp.lt.u32.totalorder %s711_s4, %s829_s0 }
  0x17   : > { %p516_p4 = pnand %p515_p3, %p514_p2  ;;  %p520_p8 = scmp.lt.u32.totalorder %s518_s17, %s513_s9 }
  0x18   : > { %p522_p9 = scmp.lt.u32.totalorder %s513_s9, %s711_s4 }
  0x19   : > { %p517_p7 = pneg %p516_p4  ;;  %p521_p10 = por %p520_p8, %p519_p5 }
  0x1b   : > { %p523_p0 = por %p522_p9, %p521_p10 }
  0x1d   : > { %p524_p1 = pnand %p523_p0, %p517_p7 }
  0x1f   : > { %527 = shalt.err (!%p524_p1)
}
  0x20   : > { %s528_s22 = scalar_lea.vmem %s719_s6, 64  ;;  %s611_s26 = smov [#allocation3]  }
  0x21   : > { %p529_p2 = scmp.ne.s32.totalorder %s719_s6, %s528_s22  ;;  %s533_s27 = sshll.u32 %s611_s26, 4  ;;  %s534_s27 = int_to_ptr.vmem [resolvable:$false] %s533_s27 }
  0x22   : > { %s535_s28 = scalar_lea.vmem %s534_s27, 128  ;;  %p536_p11 = scmp.lt.s32.totalorder %s719_s6, %s534_s27 }
  0x23   : > { %p531_p4 = pnand %p529_p2, %p515_p3  ;;  %p537_p5 = scmp.lt.s32.totalorder %s535_s28, %s528_s22 }
  0x25   : > { %p532_p12 = pneg %p531_p4  ;;  %p538_p8 = por %p537_p5, %p536_p11 }
  0x27   : > { %p539_p9 = pnand %p538_p8, %p532_p12 }
  0x29   : > { %542 = shalt.err (!%p539_p9)
}
  0x2a   : > { %457 = dma.hbm_to_vmem [thread:$0]  (!%p715_p13), %s711_s4, 64, %s719_s6, %s138_s8  }
  0x2b   : > { %p839_p0 = scmp.lt.s32.totalorder %s609_s15, 3  ;;  %p840_p1 = scmp.ge.s32.totalorder %s609_s15, 1 }
  0x2d   : > { %p154_p3 = pnand %p840_p1, %p839_p0 }
  0x2e   : > { %s753_s29 = sand.u32 (!%p154_p3), 1, %s601_s13  }
  0x2f   : > { %157 = sbr.rel (%p154_p3) target bundleno = 547 (0x223), region = 32  ;;  %s417_s30 = sshll.u32 (!%p154_p3), %s753_s29, 2 }
  0x30   : > { %s160_s5 = scalar_lea.sflag (!%p154_p3), [#allocation4], %s753_s29  ;;  %s163_s7 = scalar_lea.vmem (!%p154_p3), [#allocation3], %s417_s30 }
  0x36   : > { %588 = dma.done.wait (%p691_p6), %s160_s5, 64  }
  0x37   : > { %590 = vsyncadd (%p691_p6), %s160_s5, 4294967232  ;;  %v186_v0 = vld [vmem:[%s163_s7] sm:$0xf]  ;;  %s612_s4 = smov 116   ;;  %s613_s6 = smov 20   ;;  %vm197_vm0 = vcmask 31744  }
  0x38   : > { %188 = vrot.lane.b32.xlu0 %v186_v0, %s612_s4  ;;  %194 = vrot.lane.b32.xlu1 %v186_v0, %s613_s6  ;;  %s614_s8 = smov 4   ;;  %vm199_vm1 = vcmask 162816   ;;  %vm201_vm2 = vcmask 125952   ;;  %s615_s9 = smov 126   ;;  %v617_v6 = vmov 0.0|0.0   ;;  %vm624_vm3 = vmmov 0  }
  0x39   : > { %s616_s23 = smov 127   ;;  %444 = vmatprep.subr.bf16.mxu0 %v617_v6  ;;  %s618_s10 = smov 124   ;;  %v625_v7 = vmov 0.0   ;;  %v242_v8 = vld [vmem:[%s831_s2] sm:$0xf]  ;;  %v626_v9 = vmov 0  }
  0x3a   : > { %s619_s11 = smov 125   ;;  %s620_s17 = smov 122   ;;  %441 = vmatprep.mubr.msk.f32.mxu0 %vm624_vm3, %v625_v7  ;;  %511 = vset.pattern.permute.xlu1 %v626_v9  ;;  %vm252_vm4 = vcmask 1043456   ;;  %v236_v24 = vld [vmem:[%s830_s1] sm:$0xf]  ;;  %vm248_vm5 = vcmask 293888  }
  0x3b   : > { %s621_s19 = smov 123   ;;  %s622_s20 = smov 120   ;;  %512 = vset.pattern.permute.xlu0 %v626_v9 }
  0x3c   : > { %191 = vrot.lane.b32.xlu0 %v186_v0, %s614_s8  ;;  %s623_s22 = smov 121   ;;  %s422_s7 = sshll.u32 %s669_s16, 6 }
  0x3d   : > { %s185_s4 = scalar_lea.vmem [#allocation6], %s417_s30  ;;  %p841_p11 = scmp.ne.s32.totalorder %s836_s24, 0 }
  0x3e   : > { %s341_s6 = sshll.u32 %s185_s4, 4  ;;  %s627_s30 = smov [#allocation6]   ;;  %s786_s6 = int_to_ptr.vmem [resolvable:$true] %s341_s6 }
  0x3f   : > { %s543_s16 = scalar_lea.vmem %s786_s6, 64 }
  0x40   : > { %p544_p6 = scmp.ne.s32.totalorder %s786_s6, %s543_s16 }
  0x42   : > { %p545_p12 = pnand %p544_p6, %p841_p11 }
  0x44   : > { %p546_p13 = pneg %p545_p12 }
  0xaa   : > { %v189_v1 = vpop.permute.xlu0 %188  ;;  %v195_v2 = vpop.permute.xlu1 %194 }
  0xae   : > { %v192_v3 = vpop.permute.xlu0 %191 }
  0xaf   : > { %v198_v4 = vsel %vm197_vm0, %v189_v1, %v192_v3 }
  0xb0   : > { %v200_v5 = vsel %vm199_vm1, %v198_v4, %v195_v2 }
  0xb1   : > { %202 = vst.msk [vmem:[#allocation2] sm:$0xf] %vm201_vm2, %v200_v5  ;;  %208 = vrot.lane.b32.xlu0 %v200_v5, %s615_s9  ;;  %204 = vrot.lane.b32.xlu1 %v200_v5, %s616_s23  ;;  %s784_s23 = scalar_lea.hbm %s832_s3, %s422_s7 }
  0xb5   : > { %216 = vrot.lane.b32.xlu0 %v200_v5, %s618_s10  ;;  %212 = vrot.lane.b32.xlu1 %v200_v5, %s619_s11  ;;  %s328_s10 = scalar_lea.sflag [#allocation5], %s753_s29  ;;  %s547_s11 = sshll.u32 %s627_s30, 4  ;;  %s548_s11 = int_to_ptr.vmem [resolvable:$false] %s547_s11 }
  0xb6   : > { %p550_p7 = scmp.lt.s32.totalorder %s786_s6, %s548_s11 }
  0xb9   : > { %224 = vrot.lane.b32.xlu0 %v200_v5, %s620_s17  ;;  %220 = vrot.lane.b32.xlu1 %v200_v5, %s621_s19  ;;  %s549_s17 = scalar_lea.vmem %s548_s11, 128 }
  0xba   : > { %p551_p10 = scmp.lt.s32.totalorder %s549_s17, %s543_s16 }
  0xbc   : > { %p552_p2 = por %p551_p10, %p550_p7 }
  0xbd   : > { %232 = vrot.lane.b32.xlu0 %v200_v5, %s622_s20  ;;  %228 = vrot.lane.b32.xlu1 %v200_v5, %s623_s22 }
  0xbe   : > { %p553_p4 = pnand %p552_p2, %p546_p13 }
  0xc1   : > { %245 = vperm.xlu1 %511, %v242_v8  }
 0x123   : > { %v209_v10 = vpop.permute.xlu0 %208  ;;  %v205_v11 = vpop.permute.xlu1 %204 }
 0x124   : > { %211 = vst.msk [vmem:[#allocation2 + $0x8] sm:$0xf] %vm201_vm2, %v209_v10  ;;  %207 = vst.msk [vmem:[#allocation2 + $0x4] sm:$0xf] %vm201_vm2, %v205_v11 }
 0x127   : > { %v217_v12 = vpop.permute.xlu0 %216  ;;  %v213_v13 = vpop.permute.xlu1 %212 }
 0x128   : > { %219 = vst.msk [vmem:[#allocation2 + $0x10] sm:$0xf] %vm201_vm2, %v217_v12  ;;  %215 = vst.msk [vmem:[#allocation2 + $0xc] sm:$0xf] %vm201_vm2, %v213_v13 }
 0x12b   : > { %v225_v14 = vpop.permute.xlu0 %224  ;;  %v221_v15 = vpop.permute.xlu1 %220  ;;  %v237_v18 = vld [vmem:[#allocation2] sm:$0xff] }
 0x12c   : > { %227 = vst.msk [vmem:[#allocation2 + $0x18] sm:$0xf] %vm201_vm2, %v225_v14  ;;  %223 = vst.msk [vmem:[#allocation2 + $0x14] sm:$0xf] %vm201_vm2, %v221_v15 }
 0x12f   : > { %v233_v16 = vpop.permute.xlu0 %232  ;;  %v229_v17 = vpop.permute.xlu1 %228  ;;  %v238_v19 = vld [vmem:[#allocation2 + $0x8] sm:$0xff] }
 0x130   : > { %235 = vst.msk [vmem:[#allocation2 + $0x20] sm:$0xf] %vm201_vm2, %v233_v16  ;;  %231 = vst.msk [vmem:[#allocation2 + $0x1c] sm:$0xf] %vm201_vm2, %v229_v17  ;;  %v445_v20 = vpack.c.bf16 %v238_v19, %v237_v18 }
 0x132   : > { %446 = vmatpush3.bf16.msra.mxu0 %v445_v20 }
 0x133   : > { %447 = vmatprep.subr.bf16.mxu0 %v617_v6  ;;  %v239_v21 = vld [vmem:[#allocation2 + $0x10] sm:$0xff] }
 0x137   : > { %v240_v22 = vld [vmem:[#allocation2 + $0x18] sm:$0xff]  ;;  %v241_v25 = vld [vmem:[#allocation2 + $0x20] sm:$0xf] }
 0x138   : > { %v448_v23 = vpack.c.bf16 %v240_v22, %v239_v21 }
 0x13a   : > { %449 = vmatpush3.bf16.msra.mxu0 %v448_v23 }
 0x13b   : > { %439 = vmatprep.subr.mxu0 %v625_v7 }
 0x13e   : > { %440 = vmatpush3.msk.msra.mxu0 %vm252_vm4, %v241_v25 }
 0x13f   : > { %442 = vmatmul.mubr.msk.f32.vlgmr.msra.gmra.mrb[0].mxu0 %vm248_vm5, %v236_v24 }
 0x140   : > { %v246_v26 = vpop.permute.xlu1 %245 }
 0x212   : > { %v322_v27 = vpop.f32.mrb[0].mxu0 }
 0x213   : > { %v323_v28 = vadd.f32 %v322_v27, %v246_v26  ;;  %v443_v29 = vpop.f32.mrb[1].mxu0 }
 0x215   : > { %326 = vst.msk [vmem:[%s185_s4] sm:$0xf] %vm201_vm2, %v323_v28 }
 0x216   : > { %556 = shalt.err (!%p553_p4)
}
 0x217   : > { %s557_s29 = scalar_lea.hbm %s784_s23, 64  ;;  %s561_s22 = scalar_lea.hbm %s832_s3, 128 }
 0x218   : > { %p558_p5 = scmp.ne.s32.totalorder %s784_s23, %s557_s29  ;;  %p562_p0 = scmp.lt.u32.totalorder %s784_s23, %s832_s3 }
 0x219   : > { %p563_p1 = scmp.lt.u32.totalorder %s561_s22, %s557_s29  ;;  %p565_p6 = scmp.lt.u32.totalorder %s557_s29, %s784_s23 }
 0x21a   : > { %p559_p8 = pnand %p558_p5, %p841_p11 }
 0x21b   : > { %p564_p3 = por %p563_p1, %p562_p0 }
 0x21c   : > { %p560_p9 = pneg %p559_p8 }
 0x21d   : > { %p566_p12 = por %p565_p6, %p564_p3 }
 0x21f   : > { %p567_p13 = pnand %p566_p12, %p560_p9 }
 0x221   : > { %570 = shalt.err (!%p567_p13)
}
 0x222   : > { %452 = dma.vmem_to_hbm [thread:$0]  (%p841_p11), %s786_s6, 64, %s784_s23, %s328_s10  }
 0x223 PF: > { %s353_s28 = sand.u32 1, %s597_s12   ;;  %p842_p7 = scmp.ne.s32.totalorder %s837_s25, 0 }
 0x224   : > { %p843_p10 = scmp.ge.s32.totalorder %s609_s15, 2  ;;  %s354_s5 = scalar_lea.sflag [#allocation5], %s353_s28 }
 0x226   : > { %p459_p2 = pnand %p843_p10, %p842_p7 }
 0x228   : > { %592 = dma.done.wait (!%p459_p2), %s354_s5, 64  }
 0x229   : > { %594 = vsyncadd (!%p459_p2), %s354_s5, 4294967232  ;;  %p16_p4 = scmp.ge.s32.totalorder %s673_s18, 4   ;;  %s844_s12 = smov %s601_s13 }
 0x22a   : > { %s845_s13 = smov %s605_s14  ;;  %s846_s14 = smov %s685_s21 }
 0x22b   : > { %s847_s15 = smov %s673_s18  ;;  %18 = sbr.rel (!%p16_p4) target bundleno = 5 (0x5), region = 77 }
 0x232   :  { %359 = vsyncpa [#allocation4], 1 }
 0x233   :  { %361 = vsyncpa [#allocation4 + $0x1], 1 }
 0x234   :  { %362 = vsyncpa [#allocation5], 1 }
 0x235   :  { %364 = vsyncpa [#allocation5 + $0x1], 1 }

</bundles_post_ra>
